<compile_context>
chip_gen: v6e
topology: v6e:2x2x1
jax: 0.10.0
libtpu: 0.0.40
codegen_flags: <defaults>
</compile_context>

<pallas_src>
import functools

import jax
import jax.numpy as jnp
from jax.experimental import pallas as pl
from jax.experimental.pallas import tpu as pltpu

H_PAD = 128            # hidden width padded to one full lane tile
OUT_W = 2 * H_PAD      # packed output: mu in lanes [0,128), std in lanes [128,256)


def _round_up(n, m):
    return ((n + m - 1) // m) * m


def _mlp_gaussian_kernel(x_ref, w1_ref, b1_ref, w2_ref, b2_ref,
                         wh_ref, bh_ref, out_ref):
    # All matmuls (MXU) + tanh / exp (EUP) fused; one lane-dense output store.
    x = x_ref[...]
    h = jnp.tanh(
        jnp.dot(x, w1_ref[...], preferred_element_type=jnp.float32) + b1_ref[...]
    )
    h = jnp.tanh(
        jnp.dot(h, w2_ref[...], preferred_element_type=jnp.float32) + b2_ref[...]
    )
    # Merged head: y[:, :128] -> mu lanes, y[:, 128:] -> log_std lanes.
    y = jnp.dot(h, wh_ref[...], preferred_element_type=jnp.float32) + bh_ref[...]
    out_ref[:, :H_PAD] = y[:, :H_PAD].astype(out_ref.dtype)
    out_ref[:, H_PAD:] = jnp.exp(jnp.tanh(y[:, H_PAD:])).astype(out_ref.dtype)


@functools.partial(jax.jit, static_argnames=("action_dim",))
def mlp_gaussian_policy(x, kparams, action_dim):
    """x: [B, state_dim] f32. kparams: packed (padded) weights. Returns (mu, std)."""
    w1, b1, w2, b2, wh, bh = (kparams["w1"], kparams["b1"], kparams["w2"],
                              kparams["b2"], kparams["wh"], kparams["bh"])
    B, S = x.shape
    A = action_dim

    # Batch tile: multiple of 8 sublanes, capped so VMEM stays small; the grid
    # pipelines (and on v7x shards across cores) anything larger.
    TB = min(512, _round_up(B, 8))
    B_pad = _round_up(B, TB)
    if B_pad != B:
        x = jnp.pad(x, ((0, B_pad - B), (0, 0)))
    grid = (B_pad // TB,)

    in_specs = [
        pl.BlockSpec((TB, S), lambda i: (i, 0)),            # x tile (pipelined)
        pl.BlockSpec((S, H_PAD), lambda i: (0, 0)),          # weights: VMEM-resident
        pl.BlockSpec((1, H_PAD), lambda i: (0, 0)),
        pl.BlockSpec((H_PAD, H_PAD), lambda i: (0, 0)),
        pl.BlockSpec((1, H_PAD), lambda i: (0, 0)),
        pl.BlockSpec((H_PAD, OUT_W), lambda i: (0, 0)),
        pl.BlockSpec((1, OUT_W), lambda i: (0, 0)),
    ]
    out_specs = pl.BlockSpec((TB, OUT_W), lambda i: (i, 0))  # packed lane-dense slab

    # VMEM budget from actual buffers (double-buffered conservatively) + margin.
    f32 = 4
    weight_bytes = (S * H_PAD + H_PAD + H_PAD * H_PAD + H_PAD
                    + H_PAD * OUT_W + OUT_W) * f32
    io_bytes = (TB * S + TB * OUT_W) * f32
    vmem_limit = 2 * (weight_bytes + io_bytes) + (4 << 20)

    out = pl.pallas_call(
        _mlp_gaussian_kernel,
        out_shape=jax.ShapeDtypeStruct((B_pad, OUT_W), jnp.float32),
        grid=grid,
        in_specs=in_specs,
        out_specs=out_specs,
        compiler_params=pltpu.CompilerParams(
            dimension_semantics=("parallel",),
            vmem_limit_bytes=vmem_limit,
        ),
    )(x, w1, b1, w2, b2, wh, bh)

    mu = out[:B, :A]
    std = out[:B, H_PAD:H_PAD + A]
    return mu, std


def init_params(key, state_dim, action_dim, hidden_dims=(64, 64)):
    """nn.Linear-style init: U(-1/sqrt(fan_in), 1/sqrt(fan_in)). Weights are [in, out]."""
    def linear(k, fan_in, fan_out):
        kw, kb = jax.random.split(k)
        bound = 1.0 / jnp.sqrt(fan_in)
        w = jax.random.uniform(kw, (fan_in, fan_out), jnp.float32, -bound, bound)
        b = jax.random.uniform(kb, (1, fan_out), jnp.float32, -bound, bound)
        return w, b

    k1, k2, k3, k4 = jax.random.split(key, 4)
    w1, b1 = linear(k1, state_dim, hidden_dims[0])
    w2, b2 = linear(k2, hidden_dims[0], hidden_dims[1])
    wmu, bmu = linear(k3, hidden_dims[1], action_dim)
    wls, bls = linear(k4, hidden_dims[1], action_dim)
    return dict(w1=w1, b1=b1, w2=w2, b2=b2, wmu=wmu, bmu=bmu, wls=wls, bls=bls)


def pack_params(p, state_dim, action_dim, hidden_dims=(64, 64)):
    """Zero-pad feature dims to 128 lanes and merge the two heads into one [128, 256]
    weight (mu -> lanes [0,128), log_std -> lanes [128,256)). Done once at init."""
    h0, h1 = hidden_dims
    w1 = jnp.zeros((state_dim, H_PAD), jnp.float32).at[:, :h0].set(p["w1"])
    b1 = jnp.zeros((1, H_PAD), jnp.float32).at[:, :h0].set(p["b1"])
    w2 = jnp.zeros((H_PAD, H_PAD), jnp.float32).at[:h0, :h1].set(p["w2"])
    b2 = jnp.zeros((1, H_PAD), jnp.float32).at[:, :h1].set(p["b2"])
    wh = (jnp.zeros((H_PAD, OUT_W), jnp.float32)
          .at[:h1, :action_dim].set(p["wmu"])
          .at[:h1, H_PAD:H_PAD + action_dim].set(p["wls"]))
    bh = (jnp.zeros((1, OUT_W), jnp.float32)
          .at[:, :action_dim].set(p["bmu"])
          .at[:, H_PAD:H_PAD + action_dim].set(p["bls"]))
    return dict(w1=w1, b1=b1, w2=w2, b2=b2, wh=wh, bh=bh)


def reference_forward(x, p):
    h = jnp.tanh(x @ p["w1"] + p["b1"])
    h = jnp.tanh(h @ p["w2"] + p["b2"])
    mu = h @ p["wmu"] + p["bmu"]
    std = jnp.exp(jnp.tanh(h @ p["wls"] + p["bls"]))
    return mu, std


if __name__ == "__main__":
    key = jax.random.PRNGKey(0)
    kx, kp, kx2 = jax.random.split(key, 3)

    batch, state_dim, action_dim = 8, 16, 4
    x = jax.random.normal(kx, (batch, state_dim), jnp.float32)
    params = init_params(kp, state_dim, action_dim, hidden_dims=(64, 64))
    kparams = jax.tree_util.tree_map(
        jax.block_until_ready, pack_params(params, state_dim, action_dim))

    # Small-batch path (single grid step).
    mu, std = mlp_gaussian_policy(x, kparams, action_dim)
    jax.block_until_ready((mu, std))
    mu_ref, std_ref = reference_forward(x, params)
    assert mu.shape == (batch, action_dim) and std.shape == (batch, action_dim)
    assert jnp.allclose(mu, mu_ref, atol=1e-5, rtol=1e-5)
    assert jnp.allclose(std, std_ref, atol=1e-5, rtol=1e-5)
    assert bool(jnp.all(std > 0.0))

    # Larger batch exercises the batch-tiled grid (TB=512, 2 steps) + row padding.
    big_batch = 1000
    xb = jax.random.normal(kx2, (big_batch, state_dim), jnp.float32)
    mu_b, std_b = mlp_gaussian_policy(xb, kparams, action_dim)
    jax.block_until_ready((mu_b, std_b))
    mu_br, std_br = reference_forward(xb, params)
    assert mu_b.shape == (big_batch, action_dim)
    assert jnp.allclose(mu_b, mu_br, atol=1e-5, rtol=1e-5)
    assert jnp.allclose(std_b, std_br, atol=1e-5, rtol=1e-5)

    print("KERNEL_OK")
</pallas_src>

<mosaic_0001>
module attributes {stable_mosaic.version = 11 : i64} {
  func.func @_mlp_gaussian_kernel(%arg0: i32, %arg1: memref<8x16xf32, #tpu.memory_space<vmem>>, %arg2: memref<16x128xf32, #tpu.memory_space<vmem>>, %arg3: memref<1x128xf32, #tpu.memory_space<vmem>>, %arg4: memref<128x128xf32, #tpu.memory_space<vmem>>, %arg5: memref<1x128xf32, #tpu.memory_space<vmem>>, %arg6: memref<128x256xf32, #tpu.memory_space<vmem>>, %arg7: memref<1x256xf32, #tpu.memory_space<vmem>>, %arg8: memref<8x256xf32, #tpu.memory_space<vmem>>) attributes {dimension_semantics = [#tpu.dimension_semantics<parallel>], iteration_bounds = array<i64: 1>, scalar_prefetch = 0 : i64, scratch_operands = 0 : i64, tpu.core_type = #tpu.core_type<tc>, window_params = [{transform_indices = @transform_0, window_bounds = array<i64: 8, 16>}, {pipeline_mode = #tpu.pipeline_mode<synchronous>, transform_indices = @transform_1, window_bounds = array<i64: 16, 128>}, {pipeline_mode = #tpu.pipeline_mode<synchronous>, transform_indices = @transform_2, window_bounds = array<i64: 1, 128>}, {pipeline_mode = #tpu.pipeline_mode<synchronous>, transform_indices = @transform_3, window_bounds = array<i64: 128, 128>}, {pipeline_mode = #tpu.pipeline_mode<synchronous>, transform_indices = @transform_4, window_bounds = array<i64: 1, 128>}, {pipeline_mode = #tpu.pipeline_mode<synchronous>, transform_indices = @transform_5, window_bounds = array<i64: 128, 256>}, {pipeline_mode = #tpu.pipeline_mode<synchronous>, transform_indices = @transform_6, window_bounds = array<i64: 1, 256>}, {transform_indices = @transform_7, window_bounds = array<i64: 8, 256>}]} {
    %c0 = arith.constant 0 : index
    %c0_0 = arith.constant 0 : index
    %0 = vector.load %arg1[%c0, %c0_0] : memref<8x16xf32, #tpu.memory_space<vmem>>, vector<8x16xf32>
    %c0_1 = arith.constant 0 : index
    %c0_2 = arith.constant 0 : index
    %1 = vector.load %arg2[%c0_1, %c0_2] : memref<16x128xf32, #tpu.memory_space<vmem>>, vector<16x128xf32>
    %cst = arith.constant dense<0.000000e+00> : vector<8x128xf32>
    %2 = tpu.matmul %0, %1, %cst {dimension_numbers = #tpu.dot_dimension_numbers<[1], [0], [0], [1], [0, 0, 1, 1], [], []>} : vector<8x16xf32>, vector<16x128xf32>, vector<8x128xf32> -> vector<8x128xf32>
    %c0_3 = arith.constant 0 : index
    %c0_4 = arith.constant 0 : index
    %3 = vector.load %arg3[%c0_3, %c0_4] : memref<1x128xf32, #tpu.memory_space<vmem>>, vector<1x128xf32>
    %4 = vector.broadcast %3 : vector<1x128xf32> to vector<8x128xf32>
    %5 = arith.addf %2, %4 : vector<8x128xf32>
    %6 = math.tanh %5 : vector<8x128xf32>
    %c0_5 = arith.constant 0 : index
    %c0_6 = arith.constant 0 : index
    %7 = vector.load %arg4[%c0_5, %c0_6] : memref<128x128xf32, #tpu.memory_space<vmem>>, vector<128x128xf32>
    %cst_7 = arith.constant dense<0.000000e+00> : vector<8x128xf32>
    %8 = tpu.matmul %6, %7, %cst_7 {dimension_numbers = #tpu.dot_dimension_numbers<[1], [0], [0], [1], [0, 0, 1, 1], [], []>} : vector<8x128xf32>, vector<128x128xf32>, vector<8x128xf32> -> vector<8x128xf32>
    %c0_8 = arith.constant 0 : index
    %c0_9 = arith.constant 0 : index
    %9 = vector.load %arg5[%c0_8, %c0_9] : memref<1x128xf32, #tpu.memory_space<vmem>>, vector<1x128xf32>
    %10 = vector.broadcast %9 : vector<1x128xf32> to vector<8x128xf32>
    %11 = arith.addf %8, %10 : vector<8x128xf32>
    %12 = math.tanh %11 : vector<8x128xf32>
    %c0_10 = arith.constant 0 : index
    %c0_11 = arith.constant 0 : index
    %13 = vector.load %arg6[%c0_10, %c0_11] : memref<128x256xf32, #tpu.memory_space<vmem>>, vector<128x256xf32>
    %cst_12 = arith.constant dense<0.000000e+00> : vector<8x256xf32>
    %14 = tpu.matmul %12, %13, %cst_12 {dimension_numbers = #tpu.dot_dimension_numbers<[1], [0], [0], [1], [0, 0, 1, 1], [], []>} : vector<8x128xf32>, vector<128x256xf32>, vector<8x256xf32> -> vector<8x256xf32>
    %c0_13 = arith.constant 0 : index
    %c0_14 = arith.constant 0 : index
    %15 = vector.load %arg7[%c0_13, %c0_14] : memref<1x256xf32, #tpu.memory_space<vmem>>, vector<1x256xf32>
    %16 = vector.broadcast %15 : vector<1x256xf32> to vector<8x256xf32>
    %17 = arith.addf %14, %16 : vector<8x256xf32>
    %18 = vector.extract_strided_slice %17 {offsets = [0, 0], sizes = [8, 128], strides = [1, 1]} : vector<8x256xf32> to vector<8x128xf32>
    %c0_15 = arith.constant 0 : index
    %c0_16 = arith.constant 0 : index
    %19 = vector.load %arg8[%c0_15, %c0_16] : memref<8x256xf32, #tpu.memory_space<vmem>>, vector<8x128xf32>
    tpu.vector_store %arg8[%c0_15, %c0_16], %18 {strides = array<i32>} : memref<8x256xf32, #tpu.memory_space<vmem>>, vector<8x128xf32>,
    %20 = vector.extract_strided_slice %17 {offsets = [0, 128], sizes = [8, 128], strides = [1, 1]} : vector<8x256xf32> to vector<8x128xf32>
    %21 = math.tanh %20 : vector<8x128xf32>
    %22 = math.exp %21 : vector<8x128xf32>
    %c0_17 = arith.constant 0 : index
    %c128 = arith.constant 128 : index
    %23 = vector.load %arg8[%c0_17, %c128] : memref<8x256xf32, #tpu.memory_space<vmem>>, vector<8x128xf32>
    tpu.vector_store %arg8[%c0_17, %c128], %22 {strides = array<i32>} : memref<8x256xf32, #tpu.memory_space<vmem>>, vector<8x128xf32>,
    return
  }
  func.func @transform_0(%arg0: i32) -> (i32, i32) {
    %c0_i32 = arith.constant 0 : i32
    %c0_i32_0 = arith.constant 0 : i32
    return %arg0, %c0_i32 : i32, i32
  }
  func.func @transform_1(%arg0: i32) -> (i32, i32) {
    %c0_i32 = arith.constant 0 : i32
    %c0_i32_0 = arith.constant 0 : i32
    %c0_i32_1 = arith.constant 0 : i32
    return %c0_i32, %c0_i32_0 : i32, i32
  }
  func.func @transform_2(%arg0: i32) -> (i32, i32) {
    %c0_i32 = arith.constant 0 : i32
    %c0_i32_0 = arith.constant 0 : i32
    %c0_i32_1 = arith.constant 0 : i32
    return %c0_i32, %c0_i32_0 : i32, i32
  }
  func.func @transform_3(%arg0: i32) -> (i32, i32) {
    %c0_i32 = arith.constant 0 : i32
    %c0_i32_0 = arith.constant 0 : i32
    %c0_i32_1 = arith.constant 0 : i32
    return %c0_i32, %c0_i32_0 : i32, i32
  }
  func.func @transform_4(%arg0: i32) -> (i32, i32) {
    %c0_i32 = arith.constant 0 : i32
    %c0_i32_0 = arith.constant 0 : i32
    %c0_i32_1 = arith.constant 0 : i32
    return %c0_i32, %c0_i32_0 : i32, i32
  }
  func.func @transform_5(%arg0: i32) -> (i32, i32) {
    %c0_i32 = arith.constant 0 : i32
    %c0_i32_0 = arith.constant 0 : i32
    %c0_i32_1 = arith.constant 0 : i32
    return %c0_i32, %c0_i32_0 : i32, i32
  }
  func.func @transform_6(%arg0: i32) -> (i32, i32) {
    %c0_i32 = arith.constant 0 : i32
    %c0_i32_0 = arith.constant 0 : i32
    %c0_i32_1 = arith.constant 0 : i32
    return %c0_i32, %c0_i32_0 : i32, i32
  }
  func.func @transform_7(%arg0: i32) -> (i32, i32) {
    %c0_i32 = arith.constant 0 : i32
    %c0_i32_0 = arith.constant 0 : i32
    return %arg0, %c0_i32 : i32, i32
  }
}

</mosaic_0001>

<bundles_post_ra>
// kernel: mlp_gaussian_policy.1
= control target key start
LH: loop header
LB: loop body
LE: loop exit
PB: predicated region body
PF: predicated region fallthrough
CT: control target
= control target key end

     0   :  { %12 = vsyncpa [#allocation3], 0  ;;  %s670_s0 = inlined_call_operand.hbm [shape: f32[8,16], index: 0, kind: input, shape index: {}]   ;;  %s671_s1 = inlined_call_operand.hbm [shape: f32[16,128], index: 1, kind: input, shape index: {}]   ;;  %s672_s2 = inlined_call_operand.vmem [shape: f32[1,128], index: 2, kind: input, shape index: {}]   ;;  %s673_s3 = inlined_call_operand.hbm [shape: f32[128,128], index: 3, kind: input, shape index: {}]   ;;  %s674_s4 = inlined_call_operand.hbm [shape: f32[1,128], index: 4, kind: input, shape index: {}]   ;;  %s675_s5 = inlined_call_operand.hbm [shape: f32[128,256], index: 5, kind: input, shape index: {}]   ;;  %s676_s6 = inlined_call_operand.vmem [shape: f32[1,256], index: 6, kind: input, shape index: {}]   ;;  %s677_s7 = inlined_call_operand.vmem [shape: f32[8,256], index: 7, kind: output, shape index: {}]  }
   0x1   :  { %13 = vsyncpa [#allocation5], 0 }
   0x2   :  { %14 = vsyncpa [#allocation8], 0  ;;  %s586_s24 = smov [#allocation4]  }
   0x3   :  { %s30_s25 = sshll.u32 %s586_s24, 4  ;;  %s31_s25 = int_to_ptr.vmem [resolvable:$true] %s30_s25 }
   0x4   :  { %s488_s26 = scalar_lea.vmem %s31_s25, 256  ;;  %p493_p1 = scmp.lt.s32.totalorder %s31_s25, %s31_s25 }
   0x5   :  { %p489_p0 = scmp.ne.s32.totalorder %s31_s25, %s488_s26  ;;  %p494_p2 = scmp.lt.s32.totalorder %s488_s26, %s488_s26 }
   0x7   :  { %p495_p3 = por %p494_p2, %p493_p1 }
   0x9   :  { %p496_p4 = pnand %p495_p3, %p489_p0 }
   0xb   :  { %499 = shalt.err (!%p496_p4)
}
   0xc   :  { %s587_s27 = smov 128   ;;  %s588_s28 = smov 8  }
   0xd   :  { %36 = dma.hbm_to_vmem [thread:$0]  %s671_s1, 256, %s31_s25, [#allocation5], %s587_s27, %s587_s27, %s588_s28  }
   0xe   :  { %s589_s8 = smov [#allocation7]   ;;  %s590_s10 = smov [#allocation2]  }
   0xf   :  { %s57_s9 = sshll.u32 %s589_s8, 4  ;;  %s21_s11 = sshll.u32 %s590_s10, 4  ;;  %s58_s9 = int_to_ptr.vmem [resolvable:$true] %s57_s9  ;;  %s22_s11 = int_to_ptr.vmem [resolvable:$true] %s21_s11 }
  0x10   :  { %s508_s12 = scalar_lea.vmem %s58_s9, 16  ;;  %s512_s13 = scalar_lea.vmem %s58_s9, 32 }
  0x11   :  { %p509_p5 = scmp.ne.s32.totalorder %s58_s9, %s508_s12  ;;  %p513_p6 = scmp.lt.s32.totalorder %s58_s9, %s58_s9 }
  0x12   :  { %p514_p7 = scmp.lt.s32.totalorder %s512_s13, %s508_s12 }
  0x14   :  { %p515_p8 = por %p514_p7, %p513_p6 }
  0x16   :  { %p516_p9 = pnand %p515_p8, %p509_p5 }
  0x18   :  { %519 = shalt.err (!%p516_p9)
}
  0x19   :  { %60 = dma.hbm_to_vmem [thread:$0]  %s674_s4, 16, %s58_s9, [#allocation8]  }
  0x1a   :  { %s528_s16 = scalar_lea.vmem %s22_s11, 128  ;;  %p533_p11 = scmp.lt.s32.totalorder %s22_s11, %s22_s11 }
  0x1b   :  { %p529_p10 = scmp.ne.s32.totalorder %s22_s11, %s528_s16  ;;  %p534_p12 = scmp.lt.s32.totalorder %s528_s16, %s528_s16 }
  0x1d   :  { %p535_p13 = por %p534_p12, %p533_p11 }
  0x1f   :  { %p536_p0 = pnand %p535_p13, %p529_p10 }
  0x21   :  { %539 = shalt.err (!%p536_p0)
}
  0x22   :  { %24 = dma.hbm_to_vmem [thread:$0]  %s670_s0, 128, %s22_s11, [#allocation3]  }
  0x23   :  { %s591_s18 = smov [#allocation6]   ;;  %s592_s20 = smov [#allocation9]  }
  0x24   :  { %s44_s19 = sshll.u32 %s591_s18, 4  ;;  %s66_s21 = sshll.u32 %s592_s20, 4  ;;  %s45_s19 = int_to_ptr.vmem [resolvable:$true] %s44_s19  ;;  %s67_s21 = int_to_ptr.vmem [resolvable:$true] %s66_s21 }
  0x25   :  { %s548_s22 = scalar_lea.vmem %s45_s19, 2048  ;;  %p553_p2 = scmp.lt.s32.totalorder %s45_s19, %s45_s19 }
  0x26   :  { %p549_p1 = scmp.ne.s32.totalorder %s45_s19, %s548_s22  ;;  %p554_p3 = scmp.lt.s32.totalorder %s548_s22, %s548_s22 }
  0x28   :  { %p555_p4 = por %p554_p3, %p553_p2 }
  0x2a   :  { %p556_p5 = pnand %p555_p4, %p549_p1 }
  0x2c   :  { %559 = shalt.err (!%p556_p5)
}
  0x2d   :  { %50 = dma.hbm_to_vmem [thread:$0]  %s673_s3, 2048, %s45_s19, [#allocation5], %s587_s27, %s587_s27, %s588_s28  }
  0x2e   :  { %s568_s0 = scalar_lea.vmem %s67_s21, 4096  ;;  %p573_p7 = scmp.lt.s32.totalorder %s67_s21, %s67_s21 }
  0x2f   :  { %p569_p6 = scmp.ne.s32.totalorder %s67_s21, %s568_s0  ;;  %p574_p8 = scmp.lt.s32.totalorder %s568_s0, %s568_s0 }
  0x31   :  { %p575_p9 = por %p574_p8, %p573_p7 }
  0x33   :  { %p576_p10 = pnand %p575_p9, %p569_p6 }
  0x35   :  { %579 = shalt.err (!%p576_p10)
}
  0x36   :  { %s593_s24 = smov 256   ;;  %s594_s25 = smov 16  }
  0x37   :  { %72 = dma.hbm_to_vmem [thread:$0]  %s675_s5, 4096, %s67_s21, [#allocation8], %s593_s24, %s593_s24, %s594_s25  }
  0x38   :  { %580 = dma.done.wait [#allocation3], 128  }
  0x39   :  { %581 = vsyncadd [#allocation3], 4294967168 }
  0x3a   :  { %582 = dma.done.wait [#allocation5], 2304  }
  0x3b   :  { %583 = vsyncadd [#allocation5], 4294964992 }
  0x3c   :  { %584 = dma.done.wait [#allocation8], 4112  }
  0x3d   :  { %585 = vsyncadd [#allocation8], 4294963184  ;;  %v595_v0 = vmov 0.0   ;;  %vm596_vm0 = vmmov 0   ;;  %v92_v1 = vld [vmem:[#allocation4 + $0x8] sm:$0xff]  ;;  %v91_v2 = vld [vmem:[#allocation4] sm:$0xff]  ;;  %v303_v62 = vlaneseq }
  0x3e   :  { %419 = vmatprep.subr.mxu0 %v595_v0  ;;  %423 = vmatprep.mubr.msk.f32.mxu0 %vm596_vm0, %v595_v0  ;;  %v90_v3 = vld [vmem:[#allocation2] sm:$0xff]  ;;  %vm100_vm1 = vcmask 130048   ;;  %v190_v4 = vld [vmem:[#allocation6 + $0x78] sm:$0xff]  ;;  %v189_v5 = vld [vmem:[#allocation6 + $0x70] sm:$0xff] }
  0x3f   :  { %426 = vmatprep.subr.mxu1 %v595_v0  ;;  %458 = vmatprep.mubr.msk.f32.mxu1 %vm596_vm0, %v595_v0  ;;  %v188_v6 = vld [vmem:[#allocation6 + $0x68] sm:$0xff]  ;;  %v187_v7 = vld [vmem:[#allocation6 + $0x60] sm:$0xff]  ;;  %v186_v8 = vld [vmem:[#allocation6 + $0x58] sm:$0xff]  ;;  %v304_v63 = vshrl.u32 %v303_v62, 7 }
  0x40   :  { %420 = vmatpush3.msra.mxu0 %v92_v1  ;;  %427 = vmatpush3.msra.mxu1 %v190_v4  ;;  %v185_v9 = vld [vmem:[#allocation6 + $0x50] sm:$0xff]  ;;  %v184_v10 = vld [vmem:[#allocation6 + $0x48] sm:$0xff]  ;;  %v183_v11 = vld [vmem:[#allocation6 + $0x40] sm:$0xff] }
  0x41   :  { %421 = vmatprep.subr.mxu0 %v595_v0  ;;  %428 = vmatprep.subr.mxu1 %v595_v0  ;;  %v182_v12 = vld [vmem:[#allocation6 + $0x38] sm:$0xff]  ;;  %v181_v13 = vld [vmem:[#allocation6 + $0x30] sm:$0xff]  ;;  %v180_v14 = vld [vmem:[#allocation6 + $0x28] sm:$0xff] }
  0x42   :  { %422 = vmatpush3.msra.mxu0 %v91_v2  ;;  %429 = vmatpush3.msra.mxu1 %v189_v5  ;;  %v179_v15 = vld [vmem:[#allocation6 + $0x20] sm:$0xff]  ;;  %v178_v16 = vld [vmem:[#allocation6 + $0x18] sm:$0xff]  ;;  %v177_v17 = vld [vmem:[#allocation6 + $0x10] sm:$0xff]  ;;  %v309_v2 = vsub.s32 1, %v304_v63 }
  0x43   :  { %424 = vmatmul.mubr.msk.f32.vlgmr.msra.gmra.mxu0 %vm100_vm1, %v90_v3  ;;  %430 = vmatprep.subr.mxu1 %v595_v0  ;;  %v176_v18 = vld [vmem:[#allocation6 + $0x8] sm:$0xff]  ;;  %v175_v19 = vld [vmem:[#allocation6] sm:$0xff]  ;;  %v299_v21 = vld [vmem:[#allocation9 + $0xf0] sm:$0xff] }
  0x44   :  { %377 = vmatprep.mubr.f32.mxu0 %v595_v0  ;;  %431 = vmatpush3.msra.mxu1 %v188_v6  ;;  %v300_v20 = vld [vmem:[#allocation9 + $0xf8] sm:$0xff]  ;;  %v298_v22 = vld [vmem:[#allocation9 + $0xe8] sm:$0xff]  ;;  %v297_v23 = vld [vmem:[#allocation9 + $0xe0] sm:$0xff] }
  0x45   :  { %432 = vmatprep.subr.mxu1 %v595_v0  ;;  %313 = vmatprep.subr.mxu0 %v300_v20  ;;  %v296_v24 = vld [vmem:[#allocation9 + $0xd8] sm:$0xff]  ;;  %v295_v25 = vld [vmem:[#allocation9 + $0xd0] sm:$0xff]  ;;  %v294_v26 = vld [vmem:[#allocation9 + $0xc8] sm:$0xff] }
  0x46   :  { %433 = vmatpush3.msra.mxu1 %v187_v7  ;;  %314 = vmatpush1.msra.mxu0 %v299_v21  ;;  %v293_v27 = vld [vmem:[#allocation9 + $0xc0] sm:$0xff]  ;;  %v292_v28 = vld [vmem:[#allocation9 + $0xb8] sm:$0xff]  ;;  %v291_v29 = vld [vmem:[#allocation9 + $0xb0] sm:$0xff] }
  0x47   :  { %434 = vmatprep.subr.mxu1 %v595_v0  ;;  %315 = vmatprep.subr.mxu0 %v298_v22  ;;  %v290_v30 = vld [vmem:[#allocation9 + $0xa8] sm:$0xff]  ;;  %v289_v31 = vld [vmem:[#allocation9 + $0xa0] sm:$0xff]  ;;  %v288_v32 = vld [vmem:[#allocation9 + $0x98] sm:$0xff] }
  0x48   :  { %435 = vmatpush3.msra.mxu1 %v186_v8  ;;  %316 = vmatpush1.msra.mxu0 %v297_v23  ;;  %v287_v33 = vld [vmem:[#allocation9 + $0x90] sm:$0xff]  ;;  %v286_v34 = vld [vmem:[#allocation9 + $0x88] sm:$0xff]  ;;  %v396_v35 = vld [vmem:[%s672_s2] ss:$0 sm:$0xff] }
  0x49   :  { %436 = vmatprep.subr.mxu1 %v595_v0  ;;  %317 = vmatprep.subr.mxu0 %v296_v24  ;;  %v285_v40 = vld [vmem:[#allocation9 + $0x80] sm:$0xff]  ;;  %v284_v41 = vld [vmem:[#allocation9 + $0x78] sm:$0xff]  ;;  %v283_v42 = vld [vmem:[#allocation9 + $0x70] sm:$0xff] }
  0x4a   :  { %437 = vmatpush3.msra.mxu1 %v185_v9  ;;  %318 = vmatpush1.msra.mxu0 %v295_v25  ;;  %v282_v43 = vld [vmem:[#allocation9 + $0x68] sm:$0xff]  ;;  %v281_v44 = vld [vmem:[#allocation9 + $0x60] sm:$0xff]  ;;  %v280_v45 = vld [vmem:[#allocation9 + $0x58] sm:$0xff] }
  0x4b   :  { %438 = vmatprep.subr.mxu1 %v595_v0  ;;  %319 = vmatprep.subr.mxu0 %v294_v26  ;;  %v279_v46 = vld [vmem:[#allocation9 + $0x50] sm:$0xff]  ;;  %v278_v47 = vld [vmem:[#allocation9 + $0x48] sm:$0xff]  ;;  %v277_v48 = vld [vmem:[#allocation9 + $0x40] sm:$0xff] }
  0x4c   :  { %439 = vmatpush3.msra.mxu1 %v184_v10  ;;  %320 = vmatpush1.msra.mxu0 %v293_v27  ;;  %v276_v49 = vld [vmem:[#allocation9 + $0x38] sm:$0xff]  ;;  %v275_v50 = vld [vmem:[#allocation9 + $0x30] sm:$0xff]  ;;  %v274_v51 = vld [vmem:[#allocation9 + $0x28] sm:$0xff] }
  0x4d   :  { %440 = vmatprep.subr.mxu1 %v595_v0  ;;  %321 = vmatprep.subr.mxu0 %v292_v28  ;;  %v273_v52 = vld [vmem:[#allocation9 + $0x20] sm:$0xff]  ;;  %v272_v53 = vld [vmem:[#allocation9 + $0x18] sm:$0xff]  ;;  %v271_v54 = vld [vmem:[#allocation9 + $0x10] sm:$0xff] }
  0x4e   :  { %441 = vmatpush3.msra.mxu1 %v183_v11  ;;  %322 = vmatpush1.msra.mxu0 %v291_v29  ;;  %v270_v55 = vld [vmem:[#allocation9 + $0x8] sm:$0xff]  ;;  %v269_v56 = vld [vmem:[#allocation9] sm:$0xff]  ;;  %v398_v57 = vld [vmem:[#allocation7] ss:$0 sm:$0xff] }
  0x4f   :  { %442 = vmatprep.subr.mxu1 %v595_v0  ;;  %323 = vmatprep.subr.mxu0 %v290_v30  ;;  %v301_v1 = vld [vmem:[%s676_s6] sm:$0x3] }
  0x50   :  { %443 = vmatpush3.msra.mxu1 %v182_v12  ;;  %324 = vmatpush1.msra.mxu0 %v289_v31  ;;  %v310_v4 = vrot.slane %v301_v1, %v309_v2 }
  0x51   :  { %444 = vmatprep.subr.mxu1 %v595_v0  ;;  %325 = vmatprep.subr.mxu0 %v288_v32 }
  0x52   :  { %445 = vmatpush3.msra.mxu1 %v181_v13  ;;  %326 = vmatpush1.msra.mxu0 %v287_v33 }
  0x53   :  { %446 = vmatprep.subr.mxu1 %v595_v0  ;;  %327 = vmatprep.subr.mxu0 %v286_v34 }
  0x54   :  { %447 = vmatpush3.msra.mxu1 %v180_v14  ;;  %328 = vmatpush1.msra.mxu0 %v285_v40 }
  0x55   :  { %448 = vmatprep.subr.mxu1 %v595_v0  ;;  %329 = vmatprep.subr.mxu0 %v284_v41 }
  0x56   :  { %449 = vmatpush3.msra.mxu1 %v179_v15  ;;  %330 = vmatpush1.msra.mxu0 %v283_v42 }
  0x57   :  { %450 = vmatprep.subr.mxu1 %v595_v0  ;;  %331 = vmatprep.subr.mxu0 %v282_v43 }
  0x58   :  { %451 = vmatpush3.msra.mxu1 %v178_v16  ;;  %332 = vmatpush1.msra.mxu0 %v281_v44 }
  0x59   :  { %452 = vmatprep.subr.mxu1 %v595_v0  ;;  %333 = vmatprep.subr.mxu0 %v280_v45 }
  0x5a   :  { %453 = vmatpush3.msra.mxu1 %v177_v17  ;;  %334 = vmatpush1.msra.mxu0 %v279_v46 }
  0x5b   :  { %454 = vmatprep.subr.mxu1 %v595_v0  ;;  %335 = vmatprep.subr.mxu0 %v278_v47 }
  0x5c   :  { %455 = vmatpush3.msra.mxu1 %v176_v18  ;;  %336 = vmatpush1.msra.mxu0 %v277_v48 }
  0x5d   :  { %456 = vmatprep.subr.mxu1 %v595_v0  ;;  %337 = vmatprep.subr.mxu0 %v276_v49  ;;  %v305_v0 = vsub.s32 0, %v304_v63 }
  0x5e   :  { %457 = vmatpush3.msra.mxu1 %v175_v19  ;;  %338 = vmatpush1.msra.mxu0 %v275_v50 }
  0x5f   :  { %339 = vmatprep.subr.mxu0 %v274_v51  ;;  %v306_v3 = vrot.slane %v301_v1, %v305_v0 }
  0x60   :  { %340 = vmatpush1.msra.mxu0 %v273_v52 }
  0x61   :  { %341 = vmatprep.subr.mxu0 %v272_v53 }
  0x62   :  { %342 = vmatpush1.msra.mxu0 %v271_v54 }
  0x63   :  { %343 = vmatprep.subr.mxu0 %v270_v55 }
  0x64   :  { %344 = vmatpush1.msra.mxu0 %v269_v56 }
 0x103   :  { %v170_v36 = vpop.f32.mrf.mxu0 }
 0x104   :  { %v171_v37 = vadd.f32 %v396_v35, %v170_v36 }
 0x105   :  { %v425_v38 = vpop.f32.mrf.mxu0 }
 0x106   :  { %472 = vtanh.f32 %v171_v37 }
 0x113   :  { %v473_v39 = vpop.eup %472 }
 0x114   :  { %459 = vmatmul.mubr.f32.vlgmr.msra.gmra.mxu1 %v473_v39 }
 0x1d4   :  { %v264_v58 = vpop.f32.mrf.mxu1 }
 0x1d5   :  { %v265_v59 = vadd.f32 %v398_v57, %v264_v58 }
 0x1d6   :  { %v460_v60 = vpop.f32.mrf.mxu1 }
 0x1d7   :  { %474 = vtanh.f32 %v265_v59 }
 0x1e4   :  { %v475_v61 = vpop.eup %474 }
 0x1e5   :  { %378 = vmatmul.mubr.f32.vlgmr.msra.gmra.mxu0 %v475_v61 }
 0x2a5   :  { %v379_v5 = vpop.f32.mrf.mxu0 }
 0x2a6   :  { %v380_v6 = vadd.f32 %v379_v5, %v306_v3 }
 0x2a7   :  { %v381_v7 = vpop.f32.mrf.mxu0 }
 0x2a8   :  { %384 = vst [vmem:[%s677_s7] sm:$0xff] %v380_v6  ;;  %v382_v8 = vadd.f32 %v381_v7, %v310_v4 }
 0x2aa   :  { %476 = vtanh.f32 %v382_v8 }
 0x2b7   :  { %v477_v9 = vpop.eup %476 }
 0x2b8   :  { %v386_v10 = vmul.f32 1.442695, %v477_v9 }
 0x2ba   :  { %478 = vpow2.f32 %v386_v10 }
 0x2c7   :  { %v479_v11 = vpop.eup %478 }
 0x2c8   :  { %388 = vst [vmem:[%s677_s7 + $0x8] sm:$0xff] %v479_v11 }
 0x2c9   :  { %393 = vsyncpa [#allocation3], 1 }
 0x2ca   :  { %394 = vsyncpa [#allocation5], 1 }
 0x2cb   :  { %395 = vsyncpa [#allocation8], 1 }

</bundles_post_ra>
